<compile_context>
chip_gen: v7x
topology: tpu7x:2x2x1
jax: 0.10.0
libtpu: 0.0.40
codegen_flags: <defaults>
</compile_context>

<pallas_src>
import functools

import jax
import jax.numpy as jnp
from jax.experimental import pallas as pl
from jax.experimental.pallas import tpu as pltpu

_MIB = 1024 * 1024


def _round_up(v, m):
    return -(-v // m) * m


def _sublane_multiple(dtype):
    return max(8, 32 // jnp.dtype(dtype).itemsize)  # 8 f32, 16 bf16, 32 int8


def _vmem_budget_bytes():
    """Usable VMEM budget in bytes, safe on v5e/v6e (128 MiB) and v7x (64 MiB)."""
    try:
        cap = int(getattr(pltpu.get_tpu_info(), "vmem_capacity_bytes", 64 * _MIB))
    except Exception:
        cap = 64 * _MIB  # conservative (v7x-sized) fallback
    return max(32 * _MIB, min(cap - 8 * _MIB, 96 * _MIB))


# ---------------------------------------------------------------------------
# Kernels
# ---------------------------------------------------------------------------
def _gdl_block_kernel(binary_ref, x_ref, o_ref, *, drop_th, inv_c):
    """Main path: x_ref is (Bp, C, HW) — full (C, HW) slab(s) per grid step."""
    # f32-accumulating channel sum (no full f32 copy of the tile).
    att = jnp.sum(x_ref[...], axis=1, keepdims=True, dtype=jnp.float32) * inv_c
    binary = binary_ref[0]  # scalar 0. or 1. from SMEM

    def importance(a):  # binary == 0: sigmoid on the EUP
        return (jax.nn.sigmoid(a) + 1.0) * 0.5

    def dropmask(a):    # binary == 1: per-batch spatial max threshold (XLU)
        thr = jnp.max(a, axis=2, keepdims=True) * jnp.float32(drop_th)
        return ((a < thr).astype(jnp.float32) + 1.0) * 0.5

    # Value-returning cond: scale lives in vregs, no scratch round trip.
    scale = jax.lax.cond(binary < 0.5, importance, dropmask, att)  # (Bp,1,HW)

    # (x*sel + x)/2 == x * ((sel+1)*0.5): one broadcast multiply, in x's dtype.
    # TODO(synk): for bf16 inputs the blend is done in bf16 (reference blends
    # in f32 then casts); acceptable rounding difference, undocumented in tests.
    o_ref[...] = x_ref[...] * scale.astype(o_ref.dtype)


def _gdl_attmax_kernel(x_ref, mx_ref, *, inv_c, hw_valid):
    """Fallback pass 1: running per-batch max of the channel-mean attention.

    x_ref: (1, C, hw_tile), mx_ref: (1, 1, 128) accumulator (resident per batch).
    """
    h = pl.program_id(1)

    @pl.when(h == 0)
    def _():
        mx_ref[...] = jnp.full(mx_ref.shape, -jnp.inf, jnp.float32)

    att = jnp.sum(x_ref[...], axis=1, keepdims=True, dtype=jnp.float32) * inv_c
    tile = att.shape[-1]
    # Mask the ragged boundary tile (padded lanes hold unspecified data).
    col = jax.lax.broadcasted_iota(jnp.int32, att.shape, 2) + h * tile
    att = jnp.where(col < hw_valid, att, -jnp.inf)
    mx_ref[...] = jnp.maximum(mx_ref[...], jnp.max(att, axis=-1, keepdims=True))


def _gdl_hwtile_kernel(binary_ref, bmax_ref, x_ref, o_ref, *, drop_th, inv_c):
    """Fallback pass 2: HW-tiled apply. bmax_ref is SMEM (B,) per-batch max."""
    att = jnp.sum(x_ref[...], axis=1, keepdims=True, dtype=jnp.float32) * inv_c
    binary = binary_ref[0]
    thr = bmax_ref[pl.program_id(0)] * jnp.float32(drop_th)  # scalar from SMEM

    def importance(a):
        return (jax.nn.sigmoid(a) + 1.0) * 0.5

    def dropmask(a):
        return ((a < thr).astype(jnp.float32) + 1.0) * 0.5

    scale = jax.lax.cond(binary < 0.5, importance, dropmask, att)
    o_ref[...] = x_ref[...] * scale.astype(o_ref.dtype)


# ---------------------------------------------------------------------------
# Wrappers
# ---------------------------------------------------------------------------
def _gdl_batch_packed(x3, binary_tensor, drop_th, *, slab_bytes, budget,
                      donate_input):
    B, C, HW = x3.shape
    headroom = 4 * _MIB
    fit_cap = max(1, (budget - headroom) // 4)          # in+out, double buffered
    bp = min(B,
             max(1, fit_cap // slab_bytes),             # VMEM fit
             max(1, (4 * _MIB) // slab_bytes))          # ~4 MiB target block
    bp = max(1, min(bp, max(1, B // min(B, 4))))        # >= min(B,4) grid steps
    grid_b = pl.cdiv(B, bp)
    vmem_limit = int(min(max(4 * bp * slab_bytes + headroom, 32 * _MIB), budget))

    return pl.pallas_call(
        functools.partial(_gdl_block_kernel, drop_th=float(drop_th), inv_c=1.0 / C),
        out_shape=jax.ShapeDtypeStruct((B, C, HW), x3.dtype),
        grid=(grid_b,),
        in_specs=[
            pl.BlockSpec(memory_space=pltpu.MemorySpace.SMEM),   # binary (1,)
            pl.BlockSpec((bp, C, HW), lambda b: (b, 0, 0)),      # x tile
        ],
        out_specs=pl.BlockSpec((bp, C, HW), lambda b: (b, 0, 0)),
        compiler_params=pltpu.CompilerParams(
            dimension_semantics=("parallel",),
            vmem_limit_bytes=vmem_limit),
        input_output_aliases=({1: 0} if donate_input else {}),
    )(binary_tensor, x3)


def _gdl_hw_tiled(x3, binary_tensor, drop_th, *, c_pad, budget, hw_tile):
    B, C, HW = x3.shape
    itemsize = jnp.dtype(x3.dtype).itemsize
    headroom = 4 * _MIB
    hw_full = _round_up(HW, 128)
    if hw_tile is None:
        lane_cap = max(128, (budget - headroom) // (4 * c_pad * itemsize))
        lane_tgt = max(128, (8 * _MIB) // (c_pad * itemsize))
        hw_tile = min(lane_cap, lane_tgt)
    hw_tile = max(128, (min(int(hw_tile), hw_full) // 128) * 128)
    n_hw = pl.cdiv(HW, hw_tile)
    inv_c = 1.0 / C
    vmem_limit = int(min(max(4 * c_pad * hw_tile * itemsize + headroom,
                             32 * _MIB), budget))

    # Pass 1 — only needed (and only run) on the drop-mask branch.
    def run_max_pass(xa):
        maxes = pl.pallas_call(
            functools.partial(_gdl_attmax_kernel, inv_c=inv_c, hw_valid=HW),
            out_shape=jax.ShapeDtypeStruct((B, 1, 128), jnp.float32),
            grid=(B, n_hw),
            in_specs=[pl.BlockSpec((1, C, hw_tile), lambda b, h: (b, 0, h))],
            out_specs=pl.BlockSpec((1, 1, 128), lambda b, h: (b, 0, 0)),
            compiler_params=pltpu.CompilerParams(
                dimension_semantics=("parallel", "arbitrary"),
                vmem_limit_bytes=vmem_limit),
        )(xa)
        return maxes[:, 0, 0]                            # (B,) f32

    bmax = jax.lax.cond(binary_tensor[0] < 0.5,
                        lambda xa: jnp.zeros((B,), jnp.float32),
                        run_max_pass, x3)

    # Pass 2 — HW-tiled apply; every (b, h) block is independent.
    return pl.pallas_call(
        functools.partial(_gdl_hwtile_kernel, drop_th=float(drop_th), inv_c=inv_c),
        out_shape=jax.ShapeDtypeStruct((B, C, HW), x3.dtype),
        grid=(B, n_hw),
        in_specs=[
            pl.BlockSpec(memory_space=pltpu.MemorySpace.SMEM),       # binary (1,)
            pl.BlockSpec(memory_space=pltpu.MemorySpace.SMEM),       # bmax (B,)
            pl.BlockSpec((1, C, hw_tile), lambda b, h: (b, 0, h)),   # x tile
        ],
        out_specs=pl.BlockSpec((1, C, hw_tile), lambda b, h: (b, 0, h)),
        compiler_params=pltpu.CompilerParams(
            dimension_semantics=("parallel", "parallel"),
            vmem_limit_bytes=vmem_limit),
    )(binary_tensor, bmax, x3)


def gdl_forward(x, binary_tensor, drop_th=0.7, *,
                donate_input=False, force_hw_tiled=False, hw_tile=None):
    """GDL forward. x: (B, C, H, W) NCHW; binary_tensor: (1,) f32 (0. or 1.).

    donate_input=True aliases x's HBM buffer to the output (main path only);
    force_hw_tiled / hw_tile are test/tuning knobs for the two-pass fallback.
    """
    B, C, H, W = x.shape
    HW = H * W
    x3 = x.reshape(B, C, HW)                           # free reshape, no HBM copy
    itemsize = jnp.dtype(x.dtype).itemsize
    budget = _vmem_budget_bytes()
    c_pad = _round_up(C, _sublane_multiple(x.dtype))
    slab_bytes = c_pad * _round_up(HW, 128) * itemsize  # one batch elem in VMEM

    use_hw_tiled = (force_hw_tiled or hw_tile is not None
                    or 4 * slab_bytes + 4 * _MIB > budget)
    if use_hw_tiled:
        out3 = _gdl_hw_tiled(x3, binary_tensor, drop_th,
                             c_pad=c_pad, budget=budget, hw_tile=hw_tile)
    else:
        out3 = _gdl_batch_packed(x3, binary_tensor, drop_th,
                                 slab_bytes=slab_bytes, budget=budget,
                                 donate_input=donate_input)
    return out3.reshape(B, C, H, W)


def gdl_reference(x, binary_tensor, drop_th=0.7):
    """Pure-JAX reference mirroring the PyTorch module."""
    xf = x.astype(jnp.float32)
    attention = jnp.mean(xf, axis=1, keepdims=True)                 # (B,1,H,W)
    importance_map = jax.nn.sigmoid(attention)
    b = x.shape[0]
    max_val = jnp.max(attention.reshape(b, -1), axis=1).reshape(b, 1, 1, 1)
    thr_val = max_val * drop_th
    drop_mask = (attention < thr_val).astype(jnp.float32)
    binary = binary_tensor[0]
    selected_map = (1.0 - binary) * importance_map + binary * drop_mask
    return ((xf * selected_map + xf) / 2.0).astype(x.dtype)


if __name__ == "__main__":
    drop_rate = 0.8
    drop_th = 0.7

    key = jax.random.PRNGKey(0)
    kx, kr, kx2, kx3 = jax.random.split(key, 4)

    # Small NCHW input consistent with a conv feature map.
    B, C, H, W = 2, 4, 16, 16
    x = jax.random.normal(kx, (B, C, H, W), dtype=jnp.float32)

    # torch.rand([]) + drop_rate, then floor -> scalar binary gate.
    random_scalar = jax.random.uniform(kr, (), dtype=jnp.float32) + drop_rate
    binary_tensor = jnp.floor(random_scalar).reshape(1).astype(jnp.float32)

    out = jax.block_until_ready(gdl_forward(x, binary_tensor, drop_th=drop_th))
    ref = gdl_reference(x, binary_tensor, drop_th=drop_th)
    assert out.shape == x.shape and out.dtype == x.dtype
    assert jnp.allclose(out, ref, atol=1e-5, rtol=1e-5)

    # Exercise both gate branches explicitly (importance map / drop mask).
    for bval in (0.0, 1.0):
        bt = jnp.array([bval], dtype=jnp.float32)
        o = jax.block_until_ready(gdl_forward(x, bt, drop_th=drop_th))
        assert jnp.allclose(o, gdl_reference(x, bt, drop_th=drop_th),
                            atol=1e-5, rtol=1e-5)

    # Non-128-multiple spatial size: full-HW lane block, no pad/crop copies.
    x2 = jax.random.normal(kx2, (2, 4, 7, 7), dtype=jnp.float32)
    for bval in (0.0, 1.0):
        bt = jnp.array([bval], dtype=jnp.float32)
        o2 = jax.block_until_ready(gdl_forward(x2, bt, drop_th=drop_th))
        assert jnp.allclose(o2, gdl_reference(x2, bt, drop_th=drop_th),
                            atol=1e-5, rtol=1e-5)

    # Exercise the HW-tiled two-pass fallback (v7x big-activation path) on a
    # small input with a ragged boundary tile (HW=320, tile=128 -> 3 tiles).
    x3 = jax.random.normal(kx3, (2, 4, 16, 20), dtype=jnp.float32)
    for bval in (0.0, 1.0):
        bt = jnp.array([bval], dtype=jnp.float32)
        o3 = jax.block_until_ready(
            gdl_forward(x3, bt, drop_th=drop_th, force_hw_tiled=True, hw_tile=128))
        assert jnp.allclose(o3, gdl_reference(x3, bt, drop_th=drop_th),
                            atol=1e-5, rtol=1e-5)

    print("KERNEL_OK")
</pallas_src>

<mosaic_0001>
module attributes {stable_mosaic.version = 11 : i64} {
  func.func @_gdl_block_kernel(%arg0: i32, %arg1: memref<1xf32, #tpu.memory_space<smem>>, %arg2: memref<1x4x256xf32, #tpu.memory_space<vmem>>, %arg3: memref<1x4x256xf32, #tpu.memory_space<vmem>>) attributes {dimension_semantics = [#tpu.dimension_semantics<parallel>], iteration_bounds = array<i64: 2>, scalar_prefetch = 0 : i64, scratch_operands = 0 : i64, tpu.core_type = #tpu.core_type<tc>, window_params = [{transform_indices = @transform_0, window_bounds = array<i64: 1>}, {transform_indices = @transform_1, window_bounds = array<i64: 1, 4, 256>}, {transform_indices = @transform_2, window_bounds = array<i64: 1, 4, 256>}]} {
    %c0 = arith.constant 0 : index
    %c0_0 = arith.constant 0 : index
    %c0_1 = arith.constant 0 : index
    %0 = vector.load %arg2[%c0, %c0_0, %c0_1] : memref<1x4x256xf32, #tpu.memory_space<vmem>>, vector<1x4x256xf32>
    %cst = arith.constant dense<0.000000e+00> : vector<1x256xf32>
    %1 = vector.multi_reduction <add>, %0, %cst [1] : vector<1x4x256xf32> to vector<1x256xf32>
    %2 = vector.shape_cast %1 : vector<1x256xf32> to vector<1x1x256xf32>
    %cst_2 = arith.constant 2.500000e-01 : f32
    %3 = vector.broadcast %cst_2 : f32 to vector<1x1x256xf32>
    %4 = arith.mulf %2, %3 : vector<1x1x256xf32>
    %c0_3 = arith.constant 0 : index
    %5 = memref.load %arg1[%c0_3] : memref<1xf32, #tpu.memory_space<smem>>
    %cst_4 = arith.constant 5.000000e-01 : f32
    %6 = arith.cmpf olt, %5, %cst_4 : f32
    %7 = arith.extui %6 : i1 to i32
    %c0_i32 = arith.constant 0 : i32
    %8 = arith.cmpi ne, %7, %c0_i32 : i32
    %9 = scf.if %8 -> (vector<1x1x256xf32>) {
      %14 = arith.negf %4 : vector<1x1x256xf32>
      %15 = math.exp %14 : vector<1x1x256xf32>
      %cst_11 = arith.constant 1.000000e+00 : f32
      %16 = vector.broadcast %cst_11 : f32 to vector<1x1x256xf32>
      %17 = arith.addf %16, %15 : vector<1x1x256xf32>
      %18 = arith.divf %16, %17 : vector<1x1x256xf32>
      %cst_12 = arith.constant 1.000000e+00 : f32
      %19 = vector.broadcast %cst_12 : f32 to vector<1x1x256xf32>
      %20 = arith.addf %18, %19 : vector<1x1x256xf32>
      %cst_13 = arith.constant 5.000000e-01 : f32
      %21 = vector.broadcast %cst_13 : f32 to vector<1x1x256xf32>
      %22 = arith.mulf %20, %21 : vector<1x1x256xf32>
      scf.yield %22 : vector<1x1x256xf32>
    } else {
      %cst_11 = arith.constant dense<0xFF800000> : vector<1x1xf32>
      %14 = vector.multi_reduction <maximumf>, %4, %cst_11 [2] : vector<1x1x256xf32> to vector<1x1xf32>
      %15 = vector.shape_cast %14 : vector<1x1xf32> to vector<1x1x1xf32>
      %cst_12 = arith.constant 0.699999988 : f32
      %16 = vector.broadcast %cst_12 : f32 to vector<1x1x1xf32>
      %17 = arith.mulf %15, %16 : vector<1x1x1xf32>
      %18 = vector.broadcast %17 : vector<1x1x1xf32> to vector<1x1x256xf32>
      %19 = arith.cmpf olt, %4, %18 : vector<1x1x256xf32>
      %20 = arith.extui %19 : vector<1x1x256xi1> to vector<1x1x256xi32>
      %21 = arith.sitofp %20 : vector<1x1x256xi32> to vector<1x1x256xf32>
      %cst_13 = arith.constant 1.000000e+00 : f32
      %22 = vector.broadcast %cst_13 : f32 to vector<1x1x256xf32>
      %23 = arith.addf %21, %22 : vector<1x1x256xf32>
      %cst_14 = arith.constant 5.000000e-01 : f32
      %24 = vector.broadcast %cst_14 : f32 to vector<1x1x256xf32>
      %25 = arith.mulf %23, %24 : vector<1x1x256xf32>
      scf.yield %25 : vector<1x1x256xf32>
    }
    %c0_5 = arith.constant 0 : index
    %c0_6 = arith.constant 0 : index
    %c0_7 = arith.constant 0 : index
    %10 = vector.load %arg2[%c0_5, %c0_6, %c0_7] : memref<1x4x256xf32, #tpu.memory_space<vmem>>, vector<1x4x256xf32>
    %11 = vector.broadcast %9 : vector<1x1x256xf32> to vector<1x4x256xf32>
    %12 = arith.mulf %10, %11 : vector<1x4x256xf32>
    %c0_8 = arith.constant 0 : index
    %c0_9 = arith.constant 0 : index
    %c0_10 = arith.constant 0 : index
    %13 = vector.load %arg3[%c0_8, %c0_9, %c0_10] : memref<1x4x256xf32, #tpu.memory_space<vmem>>, vector<1x4x256xf32>
    tpu.vector_store %arg3[%c0_8, %c0_9, %c0_10], %12 {strides = array<i32>} : memref<1x4x256xf32, #tpu.memory_space<vmem>>, vector<1x4x256xf32>,
    return
  }
  func.func @transform_0(%arg0: i32) -> i32 {
    %c0_i32 = arith.constant 0 : i32
    %c0_i32_0 = arith.constant 0 : i32
    return %c0_i32 : i32
  }
  func.func @transform_1(%arg0: i32) -> (i32, i32, i32) {
    %c0_i32 = arith.constant 0 : i32
    %c0_i32_0 = arith.constant 0 : i32
    %c0_i32_1 = arith.constant 0 : i32
    return %arg0, %c0_i32, %c0_i32_0 : i32, i32, i32
  }
  func.func @transform_2(%arg0: i32) -> (i32, i32, i32) {
    %c0_i32 = arith.constant 0 : i32
    %c0_i32_0 = arith.constant 0 : i32
    %c0_i32_1 = arith.constant 0 : i32
    return %arg0, %c0_i32, %c0_i32_0 : i32, i32, i32
  }
}

</mosaic_0001>

<bundles_post_ra>
// kernel: tpu_custom_call.1
= control target key start
LH: loop header
LB: loop body
LE: loop exit
PB: predicated region body
PF: predicated region fallthrough
CT: control target
= control target key end

     0   :  { %s723_s0 = inlined_call_operand.<no memory space> [shape: f32[1], index: 0, kind: input, shape index: {}]   ;;  %s724_s1 = inlined_call_operand.hbm [shape: f32[2,4,256], index: 1, kind: input, shape index: {}]   ;;  %s725_s2 = inlined_call_operand.hbm [shape: f32[2,4,256], index: 2, kind: output, shape index: {}]  }
   0x1   :  { %7 = sst [smem:[#allocation2]] %s723_s0 }
   0x2   :  { %8 = vsyncpa [#allocation4], 0 }
   0x3   :  { %10 = vsyncpa [#allocation4 + $0x1], 0 }
   0x4   :  { %11 = vsyncpa [#allocation5], 0 }
   0x5   :  { %13 = vsyncpa [#allocation5 + $0x1], 0  ;;  %s550_s11 = smov 0   ;;  %s552_s12 = smov 0  }
   0x6   :  { %s554_s13 = smov 0   ;;  %s556_s14 = smov 0  }
   0x7 LB: > { %s571_s0 = sadd.s32 4294967295, %s519_s14   ;;  %s315_s15 = sadd.s32 4294967294, %s519_s14   ;;  %s519_s14 = sphi %s556_s14, %s740_s14   ;;  %s515_s13 = sphi %s554_s13, %s739_s13   ;;  %s511_s12 = sphi %s552_s12, %s738_s12   ;;  %s507_s11 = sphi %s550_s11, %s737_s11  }
   0x8   : > { %s575_s16 = sadd.s32 1, %s519_s14   ;;  %s47_s17 = sadd.s32 1, %s515_s13 }
   0x9   : > { %s44_s18 = ssub.s32 %s519_s14, %s575_s16  ;;  %p54_p0 = scmp.ne.s32.totalorder %s515_s13, %s511_s12 }
   0xa   : > { %p45_p1 = scmp.eq.s32.totalorder %s44_s18, 0  ;;  %p55_p2 = scmp.eq.s32.totalorder %s519_s14, 0 }
   0xb   : > { %p60_p3 = scmp.ne.s32.totalorder %s511_s12, %s507_s11  ;;  %p61_p4 = scmp.eq.s32.totalorder %s571_s0, 0 }
   0xc   : > { %s587_s19 = scalar_select %p45_p1, %s515_s13, %s47_s17  }
   0xd   : > { %p589_p5 = por %p55_p2, %p54_p0  ;;  %p593_p6 = por %p61_p4, %p60_p3 }
   0xe   : > { %p84_p7 = scmp.eq.s32.totalorder %s571_s0, 1  ;;  %p90_p8 = scmp.eq.s32.totalorder %s315_s15, 1 }
   0xf   : > { %p355_p10 = scmp.lt.s32.totalorder %s519_s14, 2  ;;  %s113_s24 = sand.u32 1, %s515_s13  }
  0x10   : > { %p600_p11 = por %p84_p7, %p54_p0  ;;  %p604_p12 = por %p90_p8, %p60_p3 }
  0x11   : > { %s333_s25 = sshll.u32 %s519_s14, 7  ;;  %s318_s26 = sshll.u32 %s113_s24, 3 }
  0x12   : > { %s729_s22 = scalar_select %p600_p11, 1, 0 }
  0x13   : > { %s730_s23 = scalar_select %p604_p12, 1, 0 }
  0x14   : > { %s613_s29 = scalar_lea.hbm %s724_s1, %s333_s25  ;;  %s117_s30 = scalar_lea.vmem [#allocation3], %s318_s26 }
  0x15   : > { %s125_s3 = sshll.u32 %s117_s30, 4  ;;  %p617_p13 = pnand %p355_p10, %p589_p5  ;;  %s621_s3 = int_to_ptr.vmem [resolvable:$true] %s125_s3 }
  0x16   : > { %s114_s5 = scalar_lea.sflag [#allocation4], %s113_s24  ;;  %s415_s6 = scalar_lea.hbm %s613_s29, 128 }
  0x17   : > { %p416_p2 = scmp.ne.s32.totalorder %s613_s29, %s415_s6  ;;  %p417_p3 = pneg %p617_p13 }
  0x18   : > { %s420_s9 = scalar_lea.hbm %s724_s1, 256  ;;  %p421_p5 = scmp.lt.u32.totalorder %s613_s29, %s724_s1 }
  0x19   : > { %p418_p4 = pnand %p417_p3, %p416_p2  ;;  %p422_p8 = scmp.lt.u32.totalorder %s420_s9, %s415_s6 }
  0x1a   : > { %p424_p9 = scmp.lt.u32.totalorder %s415_s6, %s613_s29 }
  0x1b   : > { %p419_p7 = pneg %p418_p4  ;;  %p423_p10 = por %p422_p8, %p421_p5 }
  0x1d   : > { %p425_p0 = por %p424_p9, %p423_p10 }
  0x1f   : > { %p426_p1 = pnand %p425_p0, %p419_p7 }
  0x21   : > { %429 = shalt.err (!%p426_p1)
}
  0x22   : > { %s430_s17 = scalar_lea.vmem %s621_s3, 128  ;;  %s529_s18 = smov [#allocation3]  }
  0x23   : > { %p431_p2 = scmp.ne.s32.totalorder %s621_s3, %s430_s17  ;;  %s435_s20 = sshll.u32 %s529_s18, 4  ;;  %s436_s20 = int_to_ptr.vmem [resolvable:$false] %s435_s20 }
  0x24   : > { %s437_s24 = scalar_lea.vmem %s436_s20, 256  ;;  %p438_p11 = scmp.lt.s32.totalorder %s621_s3, %s436_s20 }
  0x25   : > { %p433_p4 = pnand %p431_p2, %p417_p3  ;;  %p439_p5 = scmp.lt.s32.totalorder %s437_s24, %s430_s17 }
  0x27   : > { %p434_p12 = pneg %p433_p4  ;;  %p440_p8 = por %p439_p5, %p438_p11 }
  0x29   : > { %p441_p9 = pnand %p440_p8, %p434_p12 }
  0x2b   : > { %444 = shalt.err (!%p441_p9)
}
  0x2c   : > { %350 = dma.hbm_to_vmem [thread:$0]  (!%p617_p13), %s613_s29, 128, %s621_s3, %s114_s5  }
  0x2d   : > { %p732_p0 = scmp.lt.s32.totalorder %s519_s14, 3  ;;  %p733_p1 = scmp.ge.s32.totalorder %s519_s14, 1 }
  0x2f   : > { %p131_p3 = pnand %p733_p1, %p732_p0 }
  0x30   : > { %s655_s25 = sand.u32 (!%p131_p3), 1, %s511_s12  }
  0x31   : > { %134 = sbr.rel (%p131_p3) target bundleno = 251 (0xfb), region = 28  ;;  %s322_s26 = sshll.u32 (!%p131_p3), %s655_s25, 3 }
  0x32   : > { %s137_s27 = scalar_lea.sflag (!%p131_p3), [#allocation4], %s655_s25  ;;  %s140_s28 = scalar_lea.vmem (!%p131_p3), [#allocation3], %s322_s26 }
  0x38   : > { %498 = dma.done.wait (%p593_p6), %s137_s27, 128  }
  0x39   : > { %500 = vsyncadd (%p593_p6), %s137_s27, 4294967168  ;;  %vm165_vm0 = vcmask 1043456   ;;  %v665_v0 = vld [vmem:[%s140_s28] sm:$0xff]  ;;  %s182_s21 = sld [smem:[#allocation2]]  ;;  %s160_s30 = scalar_lea.vmem [#allocation6], %s322_s26 }
  0x3a   : > { %v163_v1 = vcombine.high %v665_v0, %v665_v0  ;;  %v166_v2 = vsel %vm165_vm0, %v665_v0, 0.0 }
  0x3b   : > { %v167_v3 = vrot.slane %v166_v2, 4 }
  0x3c   : > { %v173_v4 = vsel %vm165_vm0, %v163_v1, 0.0 }
  0x3d   : > { %v168_v5 = vadd.f32 %v167_v3, %v166_v2  ;;  %v174_v6 = vrot.slane %v173_v4, 4 }
  0x3f   : > { %v169_v7 = vrot.slane %v168_v5, 2  ;;  %v175_v8 = vadd.f32 %v174_v6, %v173_v4  ;;  %p183_p6 = scmp.lt.f32.partialorder %s182_s21, 0.5 }
  0x40   : > { %v530_v40 = vmov (!%p183_p6), 0.0  }
  0x41   : > { %v170_v9 = vadd.f32 %v169_v7, %v168_v5  ;;  %v176_v10 = vrot.slane %v175_v8, 2  ;;  %s337_s29 = scalar_select %p183_p6, 1, 0 }
  0x43   : > { %v171_v11 = vrot.slane %v170_v9, 1  ;;  %v177_v12 = vadd.f32 %v176_v10, %v175_v8  ;;  %v338_v26 = vstv %s337_s29 }
  0x44   : > { %vm339_vm1 = vcmp.ne.s32.totalorder %v338_v26, 0 }
  0x45   : > { %v172_v13 = vadd.f32 %v171_v11, %v170_v9  ;;  %v178_v14 = vrot.slane %v177_v12, 1 }
  0x47   : > { %v179_v15 = vadd.f32 %v178_v14, %v177_v12  ;;  %v180_v16 = vmul.f32 0.25, %v172_v13  ;;  %v324_v17 = vmul.f32 -0.25, %v172_v13 }
  0x49   : > { %v181_v18 = vmul.f32 0.25, %v179_v15  ;;  %v325_v19 = vmul.f32 -0.25, %v179_v15  ;;  %v189_v20 = vmul.f32 1.442695, %v324_v17 }
  0x4b   : > { %407 = vpow2.f32 %v189_v20  ;;  %v191_v21 = vmul.f32 1.442695, %v325_v19  ;;  %v208_v37 = vmax.f32 (!%p183_p6), %v180_v16, %v181_v18 }
  0x4d   : > { %409 = vpow2.f32 %v191_v21  ;;  %209 = vmax.xlane.f32.xlu0 (!%p183_p6), %v208_v37 }
  0x55   : > { %v408_v22 = vpop.eup %407 }
  0x56   : > { %v193_v23 = vadd.f32 1.0, %v408_v22 }
  0x57   : > { %v410_v24 = vpop.eup %409 }
  0x58   : > { %v194_v25 = vadd.f32 1.0, %v410_v24  ;;  %411 = vrcp.f32 %v193_v23 }
  0x5a   : > { %413 = vrcp.f32 %v194_v25 }
  0x62   : > { %v412_v27 = vpop.eup %411 }
  0x63   : > { %v199_v28 = vadd.f32 1.0, %v412_v27 }
  0x64   : > { %v414_v29 = vpop.eup %413  ;;  %207 = sbr.rel (%p183_p6) target bundleno = 226 (0xe2), region = 40 }
  0x65   : > { %v200_v30 = vadd.f32 1.0, %v414_v29  ;;  %v201_v31 = vmul.f32 0.5, %v199_v28 }
  0x67   : > { %v202_v32 = vmul.f32 0.5, %v200_v30  ;;  %v340_v33 = vsel %vm339_vm1, %v201_v31, 0  }
  0x68   : > { %v525_v36 = vmov %v340_v33  }
  0x69   : > { %v344_v34 = vsel %vm339_vm1, %v202_v32, 0  }
  0x6a   : > { %v521_v35 = vmov %v344_v34  }
  0xda   : > { %v210_v38 = vpop.xlane.xlu0 %209 }
  0xdb   : > { %v211_v39 = vmul.f32 0.7, %v210_v38 }
  0xdd   : > { %vm212_vm2 = vcmp.lt.f32.partialorder %v180_v16, %v211_v39  ;;  %vm213_vm3 = vcmp.lt.f32.partialorder %v181_v18, %v211_v39 }
  0xde   : > { %v326_v41 = vsel %vm212_vm2, 1.0, %v530_v40  ;;  %v327_v42 = vsel %vm213_vm3, 1.0, %v530_v40 }
  0xdf   : > { %v218_v43 = vadd.f32 1.0, %v326_v41  ;;  %v219_v44 = vadd.f32 1.0, %v327_v42 }
  0xe1   : > { %v220_v36 = vmul.f32 0.5, %v218_v43   ;;  %v221_v35 = vmul.f32 0.5, %v219_v44  }
  0xe2 PF: > { %v226_v45 = vcombine.low %v527_v36, %v523_v35  ;;  %s334_s3 = sshll.u32 %s571_s0, 7  ;;  %s245_s4 = sshll.u32 %s160_s30, 4  ;;  %v527_v36 = vphi %v525_v36, %v220_v36   ;;  %v523_v35 = vphi %v521_v35, %v221_v35   ;;  %s681_s4 = int_to_ptr.vmem [resolvable:$true] %s245_s4 }
  0xe3   : > { %s679_s7 = scalar_lea.hbm %s725_s2, %s334_s3  ;;  %s231_s8 = scalar_lea.sflag [#allocation5], %s655_s25 }
  0xe4   : > { %v228_v46 = vmul.f32 %v226_v45, %v665_v0  ;;  %s445_s9 = scalar_lea.vmem %s681_s4, 128  ;;  %p734_p12 = scmp.ne.s32.totalorder %s729_s22, 0 }
  0xe5   : > { %p446_p11 = scmp.ne.s32.totalorder %s681_s4, %s445_s9  ;;  %s531_s0 = smov [#allocation6]  }
  0xe6   : > { %229 = vst [vmem:[%s160_s30] sm:$0xff] %v228_v46  ;;  %s449_s10 = sshll.u32 %s531_s0, 4  ;;  %s450_s10 = int_to_ptr.vmem [resolvable:$false] %s449_s10 }
  0xe7   : > { %p447_p13 = pnand %p446_p11, %p734_p12  ;;  %s451_s15 = scalar_lea.vmem %s450_s10, 256 }
  0xe8   : > { %p452_p10 = scmp.lt.s32.totalorder %s681_s4, %s450_s10  ;;  %p453_p2 = scmp.lt.s32.totalorder %s451_s15, %s445_s9 }
  0xe9   : > { %p448_p7 = pneg %p447_p13 }
  0xea   : > { %p454_p4 = por %p453_p2, %p452_p10 }
  0xec   : > { %p455_p5 = pnand %p454_p4, %p448_p7 }
  0xee   : > { %458 = shalt.err (!%p455_p5)
}
  0xef   : > { %s459_s17 = scalar_lea.hbm %s679_s7, 128  ;;  %s463_s24 = scalar_lea.hbm %s725_s2, 256 }
  0xf0   : > { %p460_p8 = scmp.ne.s32.totalorder %s679_s7, %s459_s17  ;;  %p464_p1 = scmp.lt.u32.totalorder %s679_s7, %s725_s2 }
  0xf1   : > { %p465_p3 = scmp.lt.u32.totalorder %s463_s24, %s459_s17  ;;  %p467_p11 = scmp.lt.u32.totalorder %s459_s17, %s679_s7 }
  0xf2   : > { %p461_p9 = pnand %p460_p8, %p734_p12 }
  0xf3   : > { %p466_p6 = por %p465_p3, %p464_p1 }
  0xf4   : > { %p462_p0 = pneg %p461_p9 }
  0xf5   : > { %p468_p13 = por %p467_p11, %p466_p6 }
  0xf7   : > { %p469_p7 = pnand %p468_p13, %p462_p0 }
  0xf9   : > { %472 = shalt.err (!%p469_p7)
}
  0xfa   : > { %345 = dma.vmem_to_hbm [thread:$0]  (%p734_p12), %s681_s4, 128, %s679_s7, %s231_s8  }
  0xfb PF: > { %s257_s27 = sand.u32 1, %s507_s11   ;;  %p735_p10 = scmp.ne.s32.totalorder %s730_s23, 0 }
  0xfc   : > { %p736_p2 = scmp.ge.s32.totalorder %s519_s14, 2  ;;  %s258_s28 = scalar_lea.sflag [#allocation5], %s257_s27 }
  0xfe   : > { %p352_p4 = pnand %p736_p2, %p735_p10 }
 0x100   : > { %502 = dma.done.wait (!%p352_p4), %s258_s28, 128  }
 0x101   : > { %504 = vsyncadd (!%p352_p4), %s258_s28, 4294967168  ;;  %p16_p5 = scmp.ge.s32.totalorder %s575_s16, 4   ;;  %s737_s11 = smov %s511_s12 }
 0x102   : > { %s738_s12 = smov %s515_s13  ;;  %s739_s13 = smov %s587_s19 }
 0x103   : > { %s740_s14 = smov %s575_s16  ;;  %18 = sbr.rel (!%p16_p5) target bundleno = 7 (0x7), region = 81 }
 0x10a   :  { %263 = vsyncpa [#allocation4], 1 }
 0x10b   :  { %265 = vsyncpa [#allocation4 + $0x1], 1 }
 0x10c   :  { %266 = vsyncpa [#allocation5], 1 }
 0x10d   :  { %268 = vsyncpa [#allocation5 + $0x1], 1 }

</bundles_post_ra>
